<compile_context>
chip_gen: v7x
topology: tpu7x:2x2x1
jax: 0.10.0
libtpu: 0.0.40
codegen_flags: <defaults>
</compile_context>

<pallas_src>
import jax
import jax.numpy as jnp
from jax.experimental import pallas as pl
from jax.experimental.pallas import tpu as pltpu


def _dropout2d_kernel(mask_ref, x_ref, o_ref):
    # mask_ref: (TILE_ROWS, 1) f32 pre-scaled keep mask (0 or 1/(1-p)).
    # Single broadcast multiply across the spatial lanes of each channel row.
    o_ref[...] = (x_ref[...] * mask_ref[...]).astype(o_ref.dtype)


def _round_up(a: int, b: int) -> int:
    return ((a + b - 1) // b) * b


def _round_down(a: int, b: int) -> int:
    return (a // b) * b


def _target_tile_bytes() -> int:
    # v7x: 2 MiB steps leave ~25% per-step overhead against ~3.2 TB/s HBM; use
    # ~8 MiB. v6e/v5e already sit near roofline at a few MiB; use ~4 MiB.
    try:
        kind = jax.devices()[0].device_kind.lower()
    except Exception:  # pragma: no cover - backend without device_kind
        kind = ""
    if "v7" in kind:
        return 8 * 1024 * 1024
    return 4 * 1024 * 1024


def my_dropout(x, p: float = 0.5, seed: int = 0, training: bool = True,
               donate_input: bool = False):
    """Pallas equivalent of MyDropout.forward (dropout2d on (N, C, H, W))."""
    if not training or p == 0.0:
        return x
    if p >= 1.0:
        # dropout2d(p=1) zeroes everything; also avoids 1/(1-p).
        return jnp.zeros_like(x)

    N, C, H, W = x.shape
    rows, hw = N * C, H * W
    dtype = x.dtype
    itemsize = dtype.itemsize

    # Unpadded flat view: no extra HBM traffic from pad/slice.
    x2 = x.reshape(rows, hw)

    # Per-channel keep decision, deterministic in `seed`, pre-scaled by 1/(1-p).
    keep = jax.random.bernoulli(jax.random.PRNGKey(seed), 1.0 - p, (rows, 1))
    mask = jnp.where(keep, 1.0 / (1.0 - p), 0.0).astype(jnp.float32)

    target = _target_tile_bytes()
    row_bytes = hw * itemsize

    if 8 * row_bytes <= target:
        # Row tiling only; full spatial extent per block (last dim == full
        # array dim, so hw need not be a multiple of 128).
        tile_cols = hw
        tile_rows = max(8, _round_down(target // row_bytes, 8))
        # Keep >= ~4 row steps (when rows allows) so both v7x TCs get work.
        steps_cap = max(8, _round_down(pl.cdiv(rows, 4), 8))
        tile_rows = min(tile_rows, _round_up(rows, 8), steps_cap)
    else:
        # Huge spatial map: a single 8-row block would blow the tile budget.
        # Tile the spatial axis too (multiples of 128 lanes) to stay VMEM-safe.
        tile_rows = 8
        tile_cols = max(128, _round_down(target // (8 * itemsize), 128))
        tile_cols = min(tile_cols, _round_up(hw, 128))

    grid = (pl.cdiv(rows, tile_rows), pl.cdiv(hw, tile_cols))

    tile_bytes = tile_rows * tile_cols * itemsize
    # Double-buffered in + out (~4x tile) plus slack; clears v5e's 16 MiB
    # default and stays well under v7x's 64 MiB physical VMEM.
    vmem_limit = int(max(32 * 1024 * 1024,
                         min(4 * tile_bytes + 8 * 1024 * 1024,
                             56 * 1024 * 1024)))

    cost = pl.CostEstimate(
        flops=rows * hw,
        transcendentals=0,
        bytes_accessed=2 * rows * hw * itemsize + rows * 4,
    )

    kwargs = {}
    if donate_input:
        kwargs["input_output_aliases"] = {1: 0}  # x2 (input idx 1) -> output 0

    out2 = pl.pallas_call(
        _dropout2d_kernel,
        out_shape=jax.ShapeDtypeStruct((rows, hw), dtype),
        grid=grid,
        in_specs=[
            pl.BlockSpec((tile_rows, 1), lambda i, j: (i, 0)),          # mask
            pl.BlockSpec((tile_rows, tile_cols), lambda i, j: (i, j)),  # x
        ],
        out_specs=pl.BlockSpec((tile_rows, tile_cols), lambda i, j: (i, j)),
        compiler_params=pltpu.CompilerParams(
            dimension_semantics=("parallel", "parallel"),
            vmem_limit_bytes=vmem_limit,
        ),
        cost_estimate=cost,
        **kwargs,
    )(mask, x2)

    return out2.reshape(N, C, H, W)


if __name__ == "__main__":
    key = jax.random.PRNGKey(0)
    # Small NCHW input consistent with a LeNet-style feature map.
    x = jax.random.normal(key, (2, 4, 16, 16), dtype=jnp.float32)

    p = 0.5
    seed = 123  # emulates the module's self.seed (freeze=True path)

    x_np = jax.device_get(x)  # snapshot before the kernel (robust to donation)

    y = my_dropout(x, p=p, seed=seed, training=True)
    y = jax.block_until_ready(y)
    y_np = jax.device_get(y)

    # dropout2d semantics: each (n, c) channel is either all zeros or x/(1-p).
    scale = 1.0 / (1.0 - p)
    ok = True
    for n in range(x_np.shape[0]):
        for c in range(x_np.shape[1]):
            ch_y = y_np[n, c]
            ch_x = x_np[n, c]
            dropped = bool(abs(ch_y).max() == 0.0)
            kept = bool(abs(ch_y - ch_x * scale).max() < 1e-5)
            ok = ok and (dropped or kept)

    # Eval mode must be identity.
    y_eval = jax.block_until_ready(my_dropout(x, p=p, seed=seed, training=False))
    ok = ok and bool(abs(jax.device_get(y_eval) - x_np).max() == 0.0)

    print("KERNEL_OK" if ok else "KERNEL_MISMATCH")
</pallas_src>

<mosaic_0001>
module attributes {stable_mosaic.version = 11 : i64} {
  func.func @_dropout2d_kernel(%arg0: i32, %arg1: i32, %arg2: memref<8x1xf32, #tpu.memory_space<vmem>>, %arg3: memref<8x256xf32, #tpu.memory_space<vmem>>, %arg4: memref<8x256xf32, #tpu.memory_space<vmem>>) attributes {dimension_semantics = [#tpu.dimension_semantics<parallel>, #tpu.dimension_semantics<parallel>], iteration_bounds = array<i64: 1, 1>, scalar_prefetch = 0 : i64, scratch_operands = 0 : i64, tpu.core_type = #tpu.core_type<tc>, window_params = [{transform_indices = @transform_0, window_bounds = array<i64: 8, 1>}, {transform_indices = @transform_1, window_bounds = array<i64: 8, 256>}, {transform_indices = @transform_2, window_bounds = array<i64: 8, 256>}]} {
    %c0 = arith.constant 0 : index
    %c0_0 = arith.constant 0 : index
    %0 = vector.load %arg3[%c0, %c0_0] : memref<8x256xf32, #tpu.memory_space<vmem>>, vector<8x256xf32>
    %c0_1 = arith.constant 0 : index
    %c0_2 = arith.constant 0 : index
    %1 = vector.load %arg2[%c0_1, %c0_2] : memref<8x1xf32, #tpu.memory_space<vmem>>, vector<8x1xf32>
    %2 = vector.broadcast %1 : vector<8x1xf32> to vector<8x256xf32>
    %3 = arith.mulf %0, %2 : vector<8x256xf32>
    %c0_3 = arith.constant 0 : index
    %c0_4 = arith.constant 0 : index
    %4 = vector.load %arg4[%c0_3, %c0_4] : memref<8x256xf32, #tpu.memory_space<vmem>>, vector<8x256xf32>
    tpu.vector_store %arg4[%c0_3, %c0_4], %3 {strides = array<i32>} : memref<8x256xf32, #tpu.memory_space<vmem>>, vector<8x256xf32>,
    return
  }
  func.func @transform_0(%arg0: i32, %arg1: i32) -> (i32, i32) {
    %c0_i32 = arith.constant 0 : i32
    %c0_i32_0 = arith.constant 0 : i32
    return %arg0, %c0_i32 : i32, i32
  }
  func.func @transform_1(%arg0: i32, %arg1: i32) -> (i32, i32) {
    %c0_i32 = arith.constant 0 : i32
    return %arg0, %arg1 : i32, i32
  }
  func.func @transform_2(%arg0: i32, %arg1: i32) -> (i32, i32) {
    %c0_i32 = arith.constant 0 : i32
    return %arg0, %arg1 : i32, i32
  }
}

</mosaic_0001>

<bundles_post_ra>
// kernel: tpu_custom_call.1
= control target key start
LH: loop header
LB: loop body
LE: loop exit
PB: predicated region body
PF: predicated region fallthrough
CT: control target
= control target key end

     0   :  { %7 = vsyncpa [#allocation3], 0  ;;  %s148_s0 = inlined_call_operand.vmem [shape: f32[8,1], index: 0, kind: input, shape index: {}]   ;;  %s149_s1 = inlined_call_operand.hbm [shape: f32[8,256], index: 1, kind: input, shape index: {}]   ;;  %s150_s2 = inlined_call_operand.hbm [shape: f32[8,256], index: 2, kind: output, shape index: {}]  }
   0x1   :  { %8 = vsyncpa [#allocation4], 0  ;;  %s103_s9 = smov [#allocation2]   ;;  %s55_s13 = scalar_lea.hbm %s149_s1, 256 }
   0x2   :  { %s17_s10 = sshll.u32 %s103_s9, 4  ;;  %p56_p0 = scmp.ne.s32.totalorder %s149_s1, %s55_s13  ;;  %s18_s10 = int_to_ptr.vmem [resolvable:$true] %s17_s10 }
   0x3   :  { %p59_p1 = scmp.lt.u32.totalorder %s55_s13, %s149_s1 }
   0x5   :  { %p61_p2 = pnand %p59_p1, %p56_p0 }
   0x7   :  { %64 = shalt.err (!%p61_p2)
}
   0x8   :  { %s65_s18 = scalar_lea.vmem %s18_s10, 256  ;;  %p70_p4 = scmp.lt.s32.totalorder %s18_s10, %s18_s10 }
   0x9   :  { %p66_p3 = scmp.ne.s32.totalorder %s18_s10, %s65_s18  ;;  %p71_p5 = scmp.lt.s32.totalorder %s65_s18, %s65_s18 }
   0xb   :  { %p72_p6 = por %p71_p5, %p70_p4 }
   0xd   :  { %p73_p7 = pnand %p72_p6, %p66_p3 }
   0xf   :  { %76 = shalt.err (!%p73_p7)
}
  0x10   :  { %20 = dma.hbm_to_vmem [thread:$0]  %s149_s1, 256, %s18_s10, [#allocation3]  }
  0x11   :  { %99 = dma.done.wait [#allocation3], 256  }
  0x12   :  { %100 = vsyncadd [#allocation3], 4294967040  ;;  %v104_v0 = vmov 0   ;;  %v26_v1 = vld [vmem:[%s148_s0] sm:$0xff]  ;;  %v25_v3 = vld [vmem:[#allocation2 + $0x8] sm:$0xff]  ;;  %s105_s23 = smov [#allocation5]  }
  0x13   :  { %54 = vset.pattern.permute.xlu0 %v104_v0  ;;  %v24_v2 = vld [vmem:[#allocation2] sm:$0xff]  ;;  %s42_s24 = sshll.u32 %s105_s23, 4  ;;  %s43_s24 = int_to_ptr.vmem [resolvable:$true] %s42_s24 }
  0x14   :  { %29 = vperm.xlu0 %54, %v26_v1   ;;  %s77_s1 = scalar_lea.vmem %s43_s24, 256  ;;  %p82_p9 = scmp.lt.s32.totalorder %s43_s24, %s43_s24 }
  0x15   :  { %p78_p8 = scmp.ne.s32.totalorder %s43_s24, %s77_s1  ;;  %p83_p10 = scmp.lt.s32.totalorder %s77_s1, %s77_s1 }
  0x17   :  { %p84_p11 = por %p83_p10, %p82_p9 }
  0x19   :  { %p85_p12 = pnand %p84_p11, %p78_p8 }
  0x93   :  { %v30_v4 = vpop.permute.xlu0 %29 }
  0x94   :  { %v32_v5 = vmul.f32 %v30_v4, %v24_v2  ;;  %v33_v6 = vmul.f32 %v30_v4, %v25_v3 }
  0x96   :  { %34 = vst [vmem:[#allocation5] sm:$0xff] %v32_v5  ;;  %35 = vst [vmem:[#allocation5 + $0x8] sm:$0xff] %v33_v6 }
  0x97   :  { %88 = shalt.err (!%p85_p12)
}
  0x98   :  { %s89_s26 = scalar_lea.hbm %s150_s2, 256 }
  0x99   :  { %p90_p13 = scmp.ne.s32.totalorder %s150_s2, %s89_s26  ;;  %p93_p0 = scmp.lt.u32.totalorder %s89_s26, %s150_s2 }
  0x9b   :  { %p95_p1 = pnand %p93_p0, %p90_p13 }
  0x9d   :  { %98 = shalt.err (!%p95_p1)
}
  0x9e   :  { %45 = dma.vmem_to_hbm [thread:$0]  %s43_s24, 256, %s150_s2, [#allocation4]  }
  0x9f   :  { %101 = dma.done.wait [#allocation4], 256  }
  0xa0   :  { %102 = vsyncadd [#allocation4], 4294967040 }
  0xa1   :  { %49 = vsyncpa [#allocation3], 1 }
  0xa2   :  { %50 = vsyncpa [#allocation4], 1 }

</bundles_post_ra>
